<compile_context>
chip_gen: v7x
topology: tpu7x:2x2x1
jax: 0.10.0
libtpu: 0.0.40
codegen_flags: <defaults>
</compile_context>

<pallas_src>
import functools

import jax
import jax.numpy as jnp
from jax import lax
from jax.experimental import pallas as pl
from jax.experimental.pallas import tpu as pltpu


def _round_up(x, m):
    return ((x + m - 1) // m) * m


def _ce_kernel(hw, tm, ignore_label, has_weights, *refs):
    # refs (has_weights=False): logits (1,C,tm), labels (1,1,tm) i32,
    #                           cw (1,C,tm) f32, loss_out (1,1,tm) f32
    # refs (has_weights=True):  ... , weights (1,1,tm) f32, loss_out (1,1,tm)
    if has_weights:
        logits_ref, labels_ref, cw_ref, w_ref, loss_ref = refs
    else:
        logits_ref, labels_ref, cw_ref, loss_ref = refs
        w_ref = None

    x = logits_ref[...].astype(jnp.float32)                  # (1, C, tm)
    labels = labels_ref[...]                                  # (1, 1, tm) i32

    # Per-pixel (per-lane) log-sum-exp along the class (sublane) axis.
    m = jnp.max(x, axis=1, keepdims=True)                     # (1, 1, tm)
    xm = x - m                                                 # (1, C, tm)
    lse_m = jnp.log(jnp.sum(jnp.exp(xm), axis=1, keepdims=True))  # lse - m

    # Class weight selected at the label row (0 elsewhere, incl. ignore_label
    # when it lies outside [0, C)); single select + mul + one XLU reduce.
    cls = lax.broadcasted_iota(jnp.int32, x.shape, 1)          # (1, C, tm)
    sel_w = jnp.where(cls == labels, cw_ref[...], 0.0)         # (1, C, tm)
    loss = jnp.sum(sel_w * (lse_m - xm), axis=1, keepdims=True)  # (1, 1, tm)
    #   = cw[label] * (logsumexp(x) - x[label])

    if has_weights:
        loss = loss * w_ref[...].astype(jnp.float32)

    # Mask the ragged tail (OOB lanes hold undefined data) and explicit ignore.
    pix = pl.program_id(1) * tm + lax.broadcasted_iota(jnp.int32, (1, 1, tm), 2)
    valid = jnp.logical_and(pix < hw, labels != ignore_label)
    loss_ref[...] = jnp.where(valid, loss, 0.0).astype(loss_ref.dtype)


def _per_pixel_ce_pallas(logits, labels, weights, class_weight, ignore_label,
                         *, tm=None):
    """Per-pixel weighted CE (ignore_label / padding -> 0). Returns (B*H*W,) f32."""
    B, C, H, W = logits.shape
    HW = H * W
    itemsize = jnp.dtype(logits.dtype).itemsize
    has_weights = weights is not None

    # ---- tile-size selection -------------------------------------------
    c_pad_in = _round_up(C, 8 if itemsize >= 4 else (16 if itemsize == 2 else 32))
    c_pad32 = _round_up(C, 8)
    # VMEM bytes needed per lane of tm (double-buffered logits & class-weight
    # blocks + in-kernel f32 temporaries estimate + small 1-sublane rows).
    per_lane = (2 * c_pad_in * itemsize      # logits, 2 pipeline buffers
                + 2 * c_pad32 * 4            # class weights, 2 buffers
                + 6 * c_pad32 * 4            # f32 temporaries (xm, exp, sel, ...)
                + 8 * 8 * 4)                 # labels / weights / loss rows
    budget = 24 << 20                         # conservative scoped-VMEM budget

    if tm is None:
        tm = (2 << 20) // max(1, c_pad_in * itemsize)   # ~2 MiB logits block
    tm = max(128, (tm // 128) * 128)
    tm = min(tm, _round_up(HW, 128))
    while per_lane * tm > budget and tm > 128:
        tm = max(128, ((tm // 2) // 128) * 128)
    # Keep both v7x TensorCores busy: aim for >= 8 grid steps.
    while B * pl.cdiv(HW, tm) < 8 and tm > 128:
        tm = max(128, ((tm // 2) // 128) * 128)
    n_tiles = pl.cdiv(HW, tm)
    vmem_limit = int(min(48 << 20, max(32 << 20, per_lane * tm + (8 << 20))))

    # ---- inputs (no HBM padding / transposes) ---------------------------
    x = logits.reshape(B, C, HW)
    lab = labels.reshape(B, 1, HW).astype(jnp.int32)
    cw_vec = (jnp.ones((C,), jnp.float32) if class_weight is None
              else class_weight.astype(jnp.float32).reshape(C))
    cw = jnp.broadcast_to(cw_vec.reshape(1, C, 1), (1, C, tm))  # lane-dense

    in_specs = [
        pl.BlockSpec((1, C, tm), lambda b, t: (b, 0, t)),
        pl.BlockSpec((1, 1, tm), lambda b, t: (b, 0, t)),
        pl.BlockSpec((1, C, tm), lambda b, t: (0, 0, 0)),
    ]
    args = [x, lab, cw]
    if has_weights:
        in_specs.append(pl.BlockSpec((1, 1, tm), lambda b, t: (b, 0, t)))
        args.append(weights.reshape(B, 1, HW).astype(jnp.float32))

    cost = pl.CostEstimate(
        flops=8 * B * HW * C,
        transcendentals=B * HW * (C + 1),
        bytes_accessed=(B * HW * C * itemsize          # logits
                        + B * HW * 4                   # labels
                        + B * HW * 4                   # loss out
                        + (B * HW * 4 if has_weights else 0)
                        + C * tm * 4),                 # class weights (once)
    )

    out = pl.pallas_call(
        functools.partial(_ce_kernel, HW, tm, ignore_label, has_weights),
        out_shape=jax.ShapeDtypeStruct((B, 1, HW), jnp.float32),
        grid_spec=pltpu.PrefetchScalarGridSpec(
            num_scalar_prefetch=0,
            grid=(B, n_tiles),
            in_specs=in_specs,
            out_specs=pl.BlockSpec((1, 1, tm), lambda b, t: (b, 0, t)),
        ),
        compiler_params=pltpu.CompilerParams(
            dimension_semantics=("parallel", "parallel"),
            vmem_limit_bytes=vmem_limit),
        cost_estimate=cost,
    )(*args)

    return out.reshape(-1)


def deeplab_ce_pallas(logits, labels, weights=None, *, ignore_label=-1,
                      top_k_percent_pixels=1.0, class_weight=None, tm=None):
    """Forward pass of DeepLabCE.

    logits: (B, C, H, W); labels: (B, H, W) int; weights: optional (B, H, W).
    """
    pixel_losses = _per_pixel_ce_pallas(
        logits, labels, weights, class_weight, ignore_label, tm=tm)
    if top_k_percent_pixels == 1.0:
        return pixel_losses.mean()
    # TODO(synk): torch.topk is a data-dependent global sort; done with
    # jax.lax.top_k outside the Pallas kernel.
    top_k = int(top_k_percent_pixels * pixel_losses.size)
    top_vals, _ = lax.top_k(pixel_losses, top_k)
    return top_vals.mean()


def deeplab_ce_ref(logits, labels, weights=None, *, ignore_label=-1,
                   top_k_percent_pixels=1.0, class_weight=None):
    """Pure-JAX reference mirroring the PyTorch forward."""
    B, C, H, W = logits.shape
    x = logits.astype(jnp.float32)
    lse = jax.scipy.special.logsumexp(x, axis=1)                     # (B,H,W)
    lab = jnp.clip(labels, 0, C - 1)
    picked = jnp.take_along_axis(x, lab[:, None, :, :], axis=1)[:, 0]
    cw = (jnp.ones((C,), jnp.float32) if class_weight is None
          else class_weight.astype(jnp.float32))
    loss = (lse - picked) * cw[lab]
    loss = jnp.where(labels == ignore_label, 0.0, loss)
    flat = loss.reshape(-1)
    if weights is not None:
        flat = flat * weights.reshape(-1).astype(jnp.float32)
    if top_k_percent_pixels == 1.0:
        return flat.mean()
    k = int(top_k_percent_pixels * flat.size)
    return lax.top_k(flat, k)[0].mean()


if __name__ == "__main__":
    key = jax.random.PRNGKey(0)
    k_x, k_l, k_m, k_w, k_p = jax.random.split(key, 5)

    # Small semantic-segmentation shapes: 2 images, 21 classes, 30x30 pixels
    # (HW = 900 is not a multiple of 128/tm -> exercises the masked tail path).
    B, C, H, W = 2, 21, 30, 30
    ignore_label = -1

    logits = jax.random.normal(k_x, (B, C, H, W), dtype=jnp.float32)
    labels = jax.random.randint(k_l, (B, H, W), 0, C, dtype=jnp.int32)
    labels = jnp.where(jax.random.uniform(k_m, (B, H, W)) < 0.1,
                       ignore_label, labels)                         # some ignored
    class_weight = 0.5 + jax.random.uniform(k_w, (C,), dtype=jnp.float32)
    pix_weights = jax.random.uniform(k_p, (B, H, W), dtype=jnp.float32)

    # Case 1: plain mean (top_k_percent_pixels = 1.0), with class weights.
    out1 = deeplab_ce_pallas(logits, labels, ignore_label=ignore_label,
                             top_k_percent_pixels=1.0,
                             class_weight=class_weight)
    out1 = jax.block_until_ready(out1)
    ref1 = deeplab_ce_ref(logits, labels, ignore_label=ignore_label,
                          top_k_percent_pixels=1.0, class_weight=class_weight)
    assert jnp.allclose(out1, ref1, atol=1e-5, rtol=1e-5), (out1, ref1)

    # Case 2: hard pixel mining (top 30% pixels), with class weights.
    out2 = deeplab_ce_pallas(logits, labels, ignore_label=ignore_label,
                             top_k_percent_pixels=0.3,
                             class_weight=class_weight)
    out2 = jax.block_until_ready(out2)
    ref2 = deeplab_ce_ref(logits, labels, ignore_label=ignore_label,
                          top_k_percent_pixels=0.3, class_weight=class_weight)
    assert jnp.allclose(out2, ref2, atol=1e-5, rtol=1e-5), (out2, ref2)

    # Case 3: per-pixel weights folded into the kernel, no class weights.
    out3 = deeplab_ce_pallas(logits, labels, pix_weights,
                             ignore_label=ignore_label,
                             top_k_percent_pixels=1.0)
    out3 = jax.block_until_ready(out3)
    ref3 = deeplab_ce_ref(logits, labels, pix_weights,
                          ignore_label=ignore_label,
                          top_k_percent_pixels=1.0)
    assert jnp.allclose(out3, ref3, atol=1e-5, rtol=1e-5), (out3, ref3)

    print("KERNEL_OK")
</pallas_src>

<mosaic_0001>
module attributes {stable_mosaic.version = 11 : i64} {
  func.func @_ce_kernel(%arg0: i32, %arg1: i32, %arg2: memref<1x21x256xf32, #tpu.memory_space<vmem>>, %arg3: memref<1x1x256xi32, #tpu.memory_space<vmem>>, %arg4: memref<1x21x256xf32, #tpu.memory_space<vmem>>, %arg5: memref<1x1x256xf32, #tpu.memory_space<vmem>>) attributes {dimension_semantics = [#tpu.dimension_semantics<parallel>, #tpu.dimension_semantics<parallel>], iteration_bounds = array<i64: 2, 4>, scalar_prefetch = 0 : i64, scratch_operands = 0 : i64, tpu.core_type = #tpu.core_type<tc>, window_params = [{transform_indices = @transform_0, window_bounds = array<i64: 1, 21, 256>}, {transform_indices = @transform_1, window_bounds = array<i64: 1, 1, 256>}, {pipeline_mode = #tpu.pipeline_mode<synchronous>, transform_indices = @transform_2, window_bounds = array<i64: 1, 21, 256>}, {transform_indices = @transform_3, window_bounds = array<i64: 1, 1, 256>}]} {
    %c0 = arith.constant 0 : index
    %c0_0 = arith.constant 0 : index
    %c0_1 = arith.constant 0 : index
    %0 = vector.load %arg2[%c0, %c0_0, %c0_1] : memref<1x21x256xf32, #tpu.memory_space<vmem>>, vector<1x21x256xf32>
    %c0_2 = arith.constant 0 : index
    %c0_3 = arith.constant 0 : index
    %c0_4 = arith.constant 0 : index
    %1 = vector.load %arg3[%c0_2, %c0_3, %c0_4] : memref<1x1x256xi32, #tpu.memory_space<vmem>>, vector<1x1x256xi32>
    %cst = arith.constant dense<0xFF800000> : vector<1x256xf32>
    %2 = vector.multi_reduction <maximumf>, %0, %cst [1] : vector<1x21x256xf32> to vector<1x256xf32>
    %3 = vector.shape_cast %2 : vector<1x256xf32> to vector<1x1x256xf32>
    %4 = vector.broadcast %3 : vector<1x1x256xf32> to vector<1x21x256xf32>
    %5 = arith.subf %0, %4 : vector<1x21x256xf32>
    %6 = math.exp %5 : vector<1x21x256xf32>
    %cst_5 = arith.constant dense<0.000000e+00> : vector<1x256xf32>
    %7 = vector.multi_reduction <add>, %6, %cst_5 [1] : vector<1x21x256xf32> to vector<1x256xf32>
    %8 = vector.shape_cast %7 : vector<1x256xf32> to vector<1x1x256xf32>
    %9 = math.log %8 : vector<1x1x256xf32>
    %10 = tpu.iota {dimensions = array<i32: 1>} : vector<1x21x256xi32>
    %11 = vector.broadcast %1 : vector<1x1x256xi32> to vector<1x21x256xi32>
    %12 = arith.cmpi eq, %10, %11 : vector<1x21x256xi32>
    %c0_6 = arith.constant 0 : index
    %c0_7 = arith.constant 0 : index
    %c0_8 = arith.constant 0 : index
    %13 = vector.load %arg4[%c0_6, %c0_7, %c0_8] : memref<1x21x256xf32, #tpu.memory_space<vmem>>, vector<1x21x256xf32>
    %cst_9 = arith.constant 0.000000e+00 : f32
    %14 = vector.broadcast %cst_9 : f32 to vector<1x21x256xf32>
    %15 = arith.select %12, %13, %14 : vector<1x21x256xi1>, vector<1x21x256xf32>
    %16 = vector.broadcast %9 : vector<1x1x256xf32> to vector<1x21x256xf32>
    %17 = arith.subf %16, %5 : vector<1x21x256xf32>
    %18 = arith.mulf %15, %17 : vector<1x21x256xf32>
    %cst_10 = arith.constant dense<0.000000e+00> : vector<1x256xf32>
    %19 = vector.multi_reduction <add>, %18, %cst_10 [1] : vector<1x21x256xf32> to vector<1x256xf32>
    %20 = vector.shape_cast %19 : vector<1x256xf32> to vector<1x1x256xf32>
    %c256_i32 = arith.constant 256 : i32
    %21 = arith.muli %arg1, %c256_i32 : i32
    %22 = tpu.iota {dimensions = array<i32: 2>} : vector<1x1x256xi32>
    %23 = vector.broadcast %21 : i32 to vector<1x1x256xi32>
    %24 = arith.addi %23, %22 : vector<1x1x256xi32>
    %c900_i32 = arith.constant 900 : i32
    %25 = vector.broadcast %c900_i32 : i32 to vector<1x1x256xi32>
    %26 = arith.cmpi slt, %24, %25 : vector<1x1x256xi32>
    %c-1_i32 = arith.constant -1 : i32
    %27 = vector.broadcast %c-1_i32 : i32 to vector<1x1x256xi32>
    %28 = arith.cmpi ne, %1, %27 : vector<1x1x256xi32>
    %29 = arith.andi %26, %28 : vector<1x1x256xi1>
    %cst_11 = arith.constant 0.000000e+00 : f32
    %30 = vector.broadcast %cst_11 : f32 to vector<1x1x256xf32>
    %31 = arith.select %29, %20, %30 : vector<1x1x256xi1>, vector<1x1x256xf32>
    %c0_12 = arith.constant 0 : index
    %c0_13 = arith.constant 0 : index
    %c0_14 = arith.constant 0 : index
    %32 = vector.load %arg5[%c0_12, %c0_13, %c0_14] : memref<1x1x256xf32, #tpu.memory_space<vmem>>, vector<1x1x256xf32>
    tpu.vector_store %arg5[%c0_12, %c0_13, %c0_14], %31 {strides = array<i32>} : memref<1x1x256xf32, #tpu.memory_space<vmem>>, vector<1x1x256xf32>,
    return
  }
  func.func @transform_0(%arg0: i32, %arg1: i32) -> (i32, i32, i32) {
    %c0_i32 = arith.constant 0 : i32
    %c0_i32_0 = arith.constant 0 : i32
    return %arg0, %c0_i32, %arg1 : i32, i32, i32
  }
  func.func @transform_1(%arg0: i32, %arg1: i32) -> (i32, i32, i32) {
    %c0_i32 = arith.constant 0 : i32
    %c0_i32_0 = arith.constant 0 : i32
    return %arg0, %c0_i32, %arg1 : i32, i32, i32
  }
  func.func @transform_2(%arg0: i32, %arg1: i32) -> (i32, i32, i32) {
    %c0_i32 = arith.constant 0 : i32
    %c0_i32_0 = arith.constant 0 : i32
    %c0_i32_1 = arith.constant 0 : i32
    %c0_i32_2 = arith.constant 0 : i32
    return %c0_i32, %c0_i32_0, %c0_i32_1 : i32, i32, i32
  }
  func.func @transform_3(%arg0: i32, %arg1: i32) -> (i32, i32, i32) {
    %c0_i32 = arith.constant 0 : i32
    %c0_i32_0 = arith.constant 0 : i32
    return %arg0, %c0_i32, %arg1 : i32, i32, i32
  }
}

</mosaic_0001>

<bundles_post_ra>
// kernel: tpu_custom_call.1
= control target key start
LH: loop header
LB: loop body
LE: loop exit
PB: predicated region body
PF: predicated region fallthrough
CT: control target
= control target key end

     0   :  { %8 = vsyncpa [#allocation4], 0  ;;  %s988_s0 = inlined_call_operand.vmem [shape: f32[2,21,900], index: 0, kind: input, shape index: {}]   ;;  %s989_s1 = inlined_call_operand.vmem [shape: s32[2,1,900], index: 1, kind: input, shape index: {}]   ;;  %s990_s2 = inlined_call_operand.vmem [shape: f32[1,21,256], index: 2, kind: input, shape index: {}]   ;;  %s991_s3 = inlined_call_operand.hbm [shape: f32[2,1,900], index: 3, kind: output, shape index: {}]  }
   0x1   :  { %10 = vsyncpa [#allocation4 + $0x1], 0  ;;  %s768_s12 = smov 0   ;;  %s770_s13 = smov 0  }
   0x2   :  { %s772_s14 = smov 0   ;;  %s774_s15 = smov 0  }
   0x3   :  { %s776_s16 = smov 0   ;;  %s778_s17 = smov 0  }
   0x4   :  { %s780_s18 = smov 0   ;;  %s782_s19 = smov 0  }
   0x5 LB: > { %s540_s20 = sadd.s32 4294967295, %s743_s19   ;;  %s541_s21 = sadd.s32 4294967294, %s743_s19   ;;  %s743_s19 = sphi %s782_s19, %s16_s19   ;;  %s739_s18 = sphi %s780_s18, %s1001_s18   ;;  %s735_s17 = sphi %s778_s17, %s1000_s17   ;;  %s731_s16 = sphi %s776_s16, %s999_s16   ;;  %s727_s15 = sphi %s774_s15, %s998_s15   ;;  %s723_s14 = sphi %s772_s14, %s997_s14   ;;  %s719_s13 = sphi %s770_s13, %s996_s13   ;;  %s715_s12 = sphi %s768_s12, %s995_s12  }
   0x6   : > { %s25_s22 = sadd.s32 1, %s735_s17  ;;  %s28_s23 = sadd.s32 1, %s739_s18 }
   0x7   : > { %p26_p0 = scmp.ge.s32.totalorder %s25_s22, 4  ;;  %p44_p1 = scmp.ne.s32.totalorder %s723_s14, %s719_s13 }
   0x8   : > { %p45_p2 = scmp.eq.s32.totalorder %s743_s19, 0  ;;  %p125_p5 = scmp.eq.s32.totalorder %s540_s20, 7 }
   0x9   : > { %s1003_s22 = smov (%p26_p0, %s25_s22), 0  ;;  %s1005_s23 = smov (!%p26_p0, %s28_s23), %s739_s18 }
   0xa   : > { %s33_s24 = ssub.s32 %s735_s17, %s1003_s22  ;;  %p820_p3 = por %p45_p2, %p44_p1 }
   0xb   : > { %p30_p4 = scmp.ge.s32.totalorder %s1005_s23, 2  ;;  %p130_p6 = scmp.ne.s32.totalorder %s719_s13, %s715_s12 }
   0xc   : > { %p131_p7 = scmp.eq.s32.totalorder %s541_s21, 7  ;;  %p828_p8 = por %p125_p5, %p44_p1 }
   0xd   : > { %s1007_s23 = smov (%p30_p4, %s1005_s23), 0  ;;  %s37_s30 = sadd.s32 1, %s723_s14 }
   0xe   : > { %p832_p9 = por %p131_p7, %p130_p6  ;;  %s32_s28 = ssub.s32 %s739_s18, %s1007_s23 }
   0xf   : > { %s34_s29 = sor.u32 %s33_s24, %s32_s28  ;;  %p543_p11 = scmp.ge.s32.totalorder %s743_s19, 8 }
  0x10   : > { %p35_p10 = scmp.eq.s32.totalorder %s34_s29, 0 }
  0x11   : > { %150 = sbr.rel (%p543_p11) target bundleno = 35 (0x23), region = 20 }
  0x12   : > { %s840_s4 = scalar_select %p35_p10, %s723_s14, %s37_s30  }
  0x18   : > { %153 = sbr.rel (!%p820_p3) target bundleno = 35 (0x23), region = 24  ;;  %s155_s5 = sand.u32 (%p820_p3), 1, %s723_s14  }
  0x19   : > { %s557_s6 = smul.u32 (%p820_p3), 48, %s155_s5  ;;  %s544_s7 = sshll.u32 (%p820_p3), %s735_s17, 1 }
  0x1a   : > { %s558_s8 = smul.u32 (%p820_p3), 24, %s739_s18 }
  0x1b   : > { %s157_s24 = scalar_lea.vmem (%p820_p3), [#allocation2], %s557_s6 }
  0x1c   : > { %s160_s9 = sadd.s32 (%p820_p3), %s558_s8, %s544_s7 }
  0x1d   : > { %s545_s10 = sshll.u32 (%p820_p3), %s160_s9, 3 }
  0x1e   : > { %s162_s21 = scalar_lea.vmem (%p820_p3), %s988_s0, %s545_s10 }
  0x1f   : > { %v175_v0 = vld [vmem:[%s162_s21] sm:$0xff]  ;;  %v177_v1 = vld [vmem:[%s162_s21 + $0x8] sm:$0xff] }
  0x20   : > { %v179_v2 = vld [vmem:[%s162_s21 + $0x40] sm:$0xff]  ;;  %176 = vst [vmem:[%s157_s24] sm:$0xff] %v175_v0  ;;  %178 = vst [vmem:[%s157_s24 + $0x8] sm:$0xff] %v177_v1  ;;  %v181_v3 = vld [vmem:[%s162_s21 + $0x48] sm:$0xff] }
  0x21   : > { %180 = vst [vmem:[%s157_s24 + $0x10] sm:$0xff] %v179_v2  ;;  %v183_v4 = vld [vmem:[%s162_s21 + $0x80] sm:$0xff]  ;;  %v185_v5 = vld [vmem:[%s162_s21 + $0x88] sm:$0xff]  ;;  %182 = vst [vmem:[%s157_s24 + $0x18] sm:$0xff] %v181_v3 }
  0x22   : > { %184 = vst [vmem:[%s157_s24 + $0x20] sm:$0xff] %v183_v4  ;;  %186 = vst [vmem:[%s157_s24 + $0x28] sm:$0xff] %v185_v5 }
  0x23 PF: > { %p546_p12 = scmp.ge.s32.totalorder %s743_s19, 1  ;;  %p203_p13 = scmp.lt.s32.totalorder %s743_s19, 9 }
  0x25   : > { %p204_p0 = pnand %p546_p12, %p203_p13 }
  0x26   : > { %s854_s25 = sand.u32 (!%p204_p0), 1, %s719_s13   ;;  %vm259_vm0 = vcmask (!%p204_p0), 1044480   ;;  %s878_s30 = sshll.u32 (!%p204_p0), %s727_s15, 1  ;;  %v318_v59 = vlaneseq (!%p204_p0) }
  0x27   : > { %207 = sbr.rel (%p204_p0) target bundleno = 151 (0x97), region = 51  ;;  %p243_p1 = scmp.lt.s32.totalorder (!%p204_p0), %s731_s16, 1 }
  0x28   : > { %s559_s28 = smul.u32 (!%p204_p0), 48, %s854_s25  ;;  %p245_p2 = scmp.lt.s32.totalorder (!%p204_p0), %s878_s30, 7  ;;  %v887_v0 = vshrl.u32 (!%p204_p0), %v318_v59, 7  ;;  %vm423_vm14 = vcmp.lt.s32.totalorder (!%p204_p0), %v318_v59, 256 }
  0x29   : > { %s550_s20 = sshll.u32 (!%p204_p0), %s727_s15, 8  ;;  %s547_s15 = sshll.u32 (!%p204_p0), %s854_s25, 1 }
  0x2a   : > { %s212_s29 = scalar_lea.vmem (!%p204_p0), [#allocation2], %s559_s28  ;;  %v324_v4 = vsub.s32 (!%p204_p0), 0, %v887_v0  ;;  %v328_v5 = vsub.s32 (!%p204_p0), 1, %v887_v0  ;;  %s553_s21 = sshll.u32 (!%p204_p0), %s731_s16, 3 }
  0x2b   : > { %v252_v6 = vld [vmem:[%s212_s29] sm:$0xff] (!%p204_p0)  ;;  %v253_v7 = vld [vmem:[%s212_s29 + $0x8] sm:$0xff] (!%p204_p0)  ;;  %v254_v10 = vld [vmem:[%s212_s29 + $0x10] sm:$0xff] (!%p204_p0)  ;;  %s439_s24 = sadd.s32 (!%p204_p0), %s553_s21, %s878_s30  ;;  %s747_s9 = smov (!%p204_p0), [#allocation3]  }
  0x2c   : > { %v256_v8 = vld [vmem:[%s212_s29 + $0x20] sm:$0x1f] (!%p204_p0)  ;;  %v257_v9 = vld [vmem:[%s212_s29 + $0x28] sm:$0x1f] (!%p204_p0)  ;;  %v255_v11 = vld [vmem:[%s212_s29 + $0x18] sm:$0xff] (!%p204_p0)  ;;  %s554_s28 = sshll.u32 (!%p204_p0), %s439_s24, 4 }
  0x2d   : > { %v260_v12 = vsel (!%p204_p0), %vm259_vm0, %v256_v8, -inf  ;;  %v269_v13 = vsel (!%p204_p0), %vm259_vm0, %v257_v9, -inf  ;;  %s240_s29 = scalar_lea.vmem (!%p204_p0), [#allocation3], %s547_s15  ;;  %s653_s10 = sshll.u32 (!%p204_p0), %s747_s9, 4  ;;  %s654_s10 = int_to_ptr.vmem [resolvable:$false] %s653_s10 }
  0x2e   : > { %v261_v14 = vmax.f32 %v252_v6, %v260_v12  ;;  %v270_v15 = vmax.f32 %v253_v7, %v269_v13  ;;  %s244_s5 = scalar_select %p243_p1, %s731_s16, 1  ;;  %v337_v12 = vld [vmem:[%s990_s2 + $0x8] sm:$0xff]  ;;  %v338_v13 = vld [vmem:[%s990_s2 + $0x10] sm:$0xff] }
  0x2f   : > { %s246_s6 = scalar_select %p245_p2, %s878_s30, 7 }
  0x30   : > { %v262_v16 = vmax.f32 %v261_v14, %v254_v10  ;;  %v271_v17 = vmax.f32 %v270_v15, %v255_v11  ;;  %s549_s7 = sshll.u32 %s244_s5, 3  ;;  %v339_v14 = vld [vmem:[%s990_s2 + $0x18] sm:$0xff]  ;;  %v340_v15 = vld [vmem:[%s990_s2 + $0x20] sm:$0x1f]  ;;  %s443_s5 = sshll.u32 %s240_s29, 4  ;;  %s936_s5 = int_to_ptr.vmem [resolvable:$true] %s443_s5 }
  0x31   : > { %s248_s8 = sadd.s32 %s549_s7, %s246_s6  ;;  %s934_s7 = scalar_lea.hbm %s991_s3, %s554_s28 }
  0x32   : > { %v263_v18 = vrot.slane %v262_v16, 4  ;;  %v272_v19 = vrot.slane %v271_v17, 4  ;;  %s249_s11 = scalar_lea.vmem %s989_s1, %s248_s8  ;;  %s427_s30 = scalar_lea.sflag [#allocation4], %s854_s25 }
  0x33   : > { %s649_s8 = scalar_lea.vmem %s936_s5, 32  ;;  %p656_p6 = scmp.lt.s32.totalorder %s936_s5, %s654_s10 }
  0x34   : > { %v264_v20 = vmax.f32 %v262_v16, %v263_v18  ;;  %v273_v21 = vmax.f32 %v271_v17, %v272_v19  ;;  %v341_v17 = vld [vmem:[%s990_s2 + $0x28] sm:$0x1f]  ;;  %p650_p3 = scmp.ne.s32.totalorder %s936_s5, %s649_s8 }
  0x36   : > { %v265_v22 = vrot.slane %v264_v20, 2  ;;  %v274_v23 = vrot.slane %v273_v21, 2  ;;  %p651_p4 = pnand %p650_p3, %p828_p8 }
  0x38   : > { %v266_v24 = vmax.f32 %v264_v20, %v265_v22  ;;  %v275_v25 = vmax.f32 %v273_v21, %v274_v23  ;;  %p652_p5 = pneg %p651_p4 }
  0x3a   : > { %v267_v26 = vrot.slane %v266_v24, 1  ;;  %v276_v27 = vrot.slane %v275_v25, 1 }
  0x3c   : > { %v268_v28 = vmax.f32 %v266_v24, %v267_v26  ;;  %v277_v29 = vmax.f32 %v275_v25, %v276_v27 }
  0x3e   : > { %v859_v30 = vsub.f32 %v252_v6, %v268_v28  ;;  %v861_v31 = vsub.f32 %v253_v7, %v277_v29  ;;  %v863_v32 = vsub.f32 %v254_v10, %v268_v28  ;;  %v865_v33 = vsub.f32 %v255_v11, %v277_v29  ;;  %v258_v6 = vld [vmem:[%s249_s11] sm:$0x3]  ;;  %s655_s11 = scalar_lea.vmem %s654_s10, 64 }
  0x3f   : > { %v867_v34 = vsub.f32 %v256_v8, %v268_v28  ;;  %v869_v35 = vsub.f32 %v257_v9, %v277_v29  ;;  %v325_v7 = vrot.slane %v258_v6, %v324_v4  ;;  %v329_v8 = vrot.slane %v258_v6, %v328_v5  ;;  %v336_v11 = vld [vmem:[%s990_s2] sm:$0xff]  ;;  %p657_p7 = scmp.lt.s32.totalorder %s655_s11, %s649_s8 }
  0x40   : > { %v284_v36 = vmul.f32 1.442695, %v859_v30  ;;  %v286_v37 = vmul.f32 1.442695, %v861_v31  ;;  %v288_v38 = vmul.f32 1.442695, %v863_v32 }
  0x41   : > { %v290_v39 = vmul.f32 1.442695, %v865_v33  ;;  %v292_v40 = vmul.f32 1.442695, %v867_v34  ;;  %v294_v41 = vmul.f32 1.442695, %v869_v35  ;;  %vm330_vm1 = vcmp.eq.s32.totalorder %v887_v0, %v325_v7  ;;  %p658_p10 = por %p657_p7, %p656_p6 }
  0x42   : > { %633 = vpow2.f32 %v284_v36  ;;  %v320_v9 = vadd.s32 8, %v887_v0  ;;  %v321_v10 = vadd.s32 16, %v887_v0  ;;  %vm331_vm2 = vcmp.eq.s32.totalorder %v887_v0, %v329_v8 }
  0x43   : > { %635 = vpow2.f32 %v286_v37  ;;  %v342_v20 = vsel %vm330_vm1, %v336_v11, 0.0  ;;  %v343_v21 = vsel %vm331_vm2, %v337_v12, 0.0  ;;  %vm387_vm7 = vcmp.ne.s32.totalorder %v258_v6, 4294967295  ;;  %p659_p11 = pnand %p658_p10, %p652_p5 }
  0x44   : > { %637 = vpow2.f32 %v288_v38  ;;  %vm332_vm3 = vcmp.eq.s32.totalorder %v320_v9, %v325_v7  ;;  %vm333_vm4 = vcmp.eq.s32.totalorder %v320_v9, %v329_v8  ;;  %vm334_vm5 = vcmp.eq.s32.totalorder %v321_v10, %v325_v7 }
  0x45   : > { %639 = vpow2.f32 %v290_v39  ;;  %vm335_vm6 = vcmp.eq.s32.totalorder %v321_v10, %v329_v8  ;;  %v344_v23 = vsel %vm332_vm3, %v338_v13, 0.0  ;;  %v345_v24 = vsel %vm333_vm4, %v339_v14, 0.0 }
  0x46   : > { %641 = vpow2.f32 %v292_v40  ;;  %v346_v25 = vsel %vm334_vm5, %v340_v15, 0.0  ;;  %v347_v26 = vsel %vm335_vm6, %v341_v17, 0.0 }
  0x47   : > { %643 = vpow2.f32 %v294_v41 }
  0x4c   : > { %v634_v42 = vpop.eup %633 }
  0x4d   : > { %v636_v43 = vpop.eup %635 }
  0x4e   : > { %v638_v44 = vpop.eup %637 }
  0x4f   : > { %v640_v45 = vpop.eup %639  ;;  %v296_v46 = vadd.f32 %v638_v44, %v634_v42 }
  0x50   : > { %v642_v47 = vpop.eup %641  ;;  %v305_v48 = vadd.f32 %v640_v45, %v636_v43  ;;  %v380_v45 = vand.u32 127, %v318_v59 }
  0x51   : > { %v644_v49 = vpop.eup %643  ;;  %v297_v50 = vsel %vm259_vm0, %v642_v47, 0.0 }
  0x52   : > { %v298_v51 = vadd.f32 %v297_v50, %v296_v46  ;;  %v306_v52 = vsel %vm259_vm0, %v644_v49, 0.0  ;;  %v381_v47 = vadd.s32 128, %v380_v45 }
  0x53   : > { %v307_v53 = vadd.f32 %v306_v52, %v305_v48  ;;  %v745_v48 = vmov 0  }
  0x54   : > { %v299_v54 = vrot.slane %v298_v51, 4  ;;  %v388_v49 = vsel %vm387_vm7, 1, %v745_v48 }
  0x55   : > { %v308_v55 = vrot.slane %v307_v53, 4 }
  0x56   : > { %v300_v56 = vadd.f32 %v299_v54, %v298_v51  ;;  %v392_v54 = vrot.slane %v388_v49, %v324_v4 }
  0x57   : > { %v309_v57 = vadd.f32 %v308_v55, %v307_v53 }
  0x58   : > { %v301_v58 = vrot.slane %v300_v56, 2  ;;  %vm397_vm9 = vcmp.ne.s32.totalorder %v392_v54, 0 }
  0x59   : > { %v310_v60 = vrot.slane %v309_v57, 2 }
  0x5a   : > { %v302_v61 = vadd.f32 %v301_v58, %v300_v56 }
  0x5b   : > { %v311_v62 = vadd.f32 %v310_v60, %v309_v57  ;;  %v396_v57 = vrot.slane %v388_v49, %v328_v5  ;;  %v746_v60 = vmov 1966171168  }
  0x5c   : > { %v303_v63 = vrot.slane %v302_v61, 1 }
  0x5d   : > { %v312_v1 = vrot.slane %v311_v62, 1  ;;  %vm398_vm11 = vcmp.ne.s32.totalorder %v396_v57, 0 }
  0x5e   : > { %v304_v2 = vadd.f32 %v303_v63, %v302_v61  ;;  %v407_v61 = vunpack.c.l.s4 %v746_v60 }
  0x5f   : > { %v313_v3 = vadd.f32 %v312_v1, %v311_v62 }
  0x60   : > { %645 = vlog2.f32 %v304_v2 }
  0x61   : > { %647 = vlog2.f32 %v313_v3  ;;  %v408_v3 = vunpack.c.0.s8 %v407_v61 }
  0x63   : > { %v411_v8 = vsub.s32 %v408_v3, %v887_v0 }
  0x6a   : > { %v646_v16 = vpop.eup %645 }
  0x6b   : > { %v648_v18 = vpop.eup %647  ;;  %v315_v19 = vmul.f32 0.6931472, %v646_v16 }
  0x6c   : > { %v317_v22 = vmul.f32 0.6931472, %v648_v18 }
  0x6d   : > { %v348_v27 = vsub.f32 %v315_v19, %v859_v30  ;;  %v350_v28 = vsub.f32 %v315_v19, %v863_v32  ;;  %v352_v29 = vsub.f32 %v315_v19, %v867_v34 }
  0x6e   : > { %v349_v36 = vsub.f32 %v317_v22, %v861_v31  ;;  %v351_v37 = vsub.f32 %v317_v22, %v865_v33  ;;  %v353_v38 = vsub.f32 %v317_v22, %v869_v35  ;;  %v382_v35 = vstv %s550_s20 }
  0x6f   : > { %v354_v39 = vmul.f32 %v348_v27, %v342_v20  ;;  %v356_v40 = vmul.f32 %v350_v28, %v344_v23  ;;  %v358_v41 = vmul.f32 %v352_v29, %v346_v25  ;;  %v383_v53 = vadd.s32 %v382_v35, %v380_v45 }
  0x70   : > { %v355_v42 = vmul.f32 %v349_v36, %v343_v21  ;;  %v357_v43 = vmul.f32 %v351_v37, %v345_v24  ;;  %v359_v44 = vmul.f32 %v353_v38, %v347_v26  ;;  %v384_v56 = vadd.s32 %v382_v35, %v381_v47 }
  0x71   : > { %v360_v46 = vadd.f32 %v356_v40, %v354_v39  ;;  %v361_v30 = vsel %vm259_vm0, %v358_v41, 0.0  ;;  %vm385_vm8 = vcmp.lt.s32.totalorder %v383_v53, 900 }
  0x72   : > { %v369_v32 = vadd.f32 %v357_v43, %v355_v42  ;;  %v370_v31 = vsel %vm259_vm0, %v359_v44, 0.0  ;;  %vm386_vm10 = vcmp.lt.s32.totalorder %v384_v56, 900  ;;  %vm399_vm12 = vmand %vm385_vm8, %vm397_vm9 }
  0x73   : > { %v362_v34 = vadd.f32 %v361_v30, %v360_v46  ;;  %vm400_vm13 = vmand %vm386_vm10, %vm398_vm11 }
  0x74   : > { %v371_v33 = vadd.f32 %v370_v31, %v369_v32 }
  0x75   : > { %v363_v50 = vrot.slane %v362_v34, 4 }
  0x76   : > { %v372_v51 = vrot.slane %v371_v33, 4 }
  0x77   : > { %v364_v52 = vadd.f32 %v363_v50, %v362_v34 }
  0x78   : > { %v373_v55 = vadd.f32 %v372_v51, %v371_v33 }
  0x79   : > { %v365_v58 = vrot.slane %v364_v52, 2 }
  0x7a   : > { %v374_v62 = vrot.slane %v373_v55, 2 }
  0x7b   : > { %v366_v63 = vadd.f32 %v365_v58, %v364_v52 }
  0x7c   : > { %v375_v1 = vadd.f32 %v374_v62, %v373_v55 }
  0x7d   : > { %v367_v2 = vrot.slane %v366_v63, 1 }
  0x7e   : > { %v376_v4 = vrot.slane %v375_v1, 1 }
  0x7f   : > { %v368_v6 = vadd.f32 %v367_v2, %v366_v63 }
  0x80   : > { %v377_v5 = vadd.f32 %v376_v4, %v375_v1 }
  0x81   : > { %v401_v7 = vsel %vm399_vm12, %v368_v6, 0.0 }
  0x82   : > { %v402_v9 = vsel %vm400_vm13, %v377_v5, 0.0 }
  0x83   : > { %v405_v10 = vcombine.low %v401_v7, %v402_v9 }
  0x85   : > { %v412_v11 = vrot.slane %v405_v10, %v411_v8 }
  0x87   : > { %v419_v12 = vrot.slane %v412_v11, %v411_v8 }
  0x89   : > { %425 = vst.msk [vmem:[%s240_s29] sm:$0x3] %vm423_vm14, %v419_v12 }
  0x8a   : > { %662 = shalt.err (!%p659_p11)
}
  0x8b   : > { %s663_s25 = scalar_lea.hbm %s934_s7, 32  ;;  %s667_s21 = scalar_lea.hbm %s991_s3, 256 }
  0x8c   : > { %p664_p12 = scmp.ne.s32.totalorder %s934_s7, %s663_s25  ;;  %p668_p1 = scmp.lt.u32.totalorder %s934_s7, %s991_s3 }
  0x8d   : > { %p669_p2 = scmp.lt.u32.totalorder %s667_s21, %s663_s25  ;;  %p671_p4 = scmp.lt.u32.totalorder %s663_s25, %s934_s7 }
  0x8e   : > { %p665_p13 = pnand %p664_p12, %p828_p8 }
  0x8f   : > { %p670_p3 = por %p669_p2, %p668_p1 }
  0x90   : > { %p666_p0 = pneg %p665_p13 }
  0x91   : > { %p672_p5 = por %p671_p4, %p670_p3 }
  0x93   : > { %p673_p6 = pnand %p672_p5, %p666_p0 }
  0x95   : > { %676 = shalt.err (!%p673_p6)
}
  0x96   : > { %560 = dma.vmem_to_hbm [thread:$0]  (%p828_p8), %s936_s5, 32, %s934_s7, %s427_s30  }
  0x97 PF: > { %p566_p7 = scmp.ge.s32.totalorder %s743_s19, 2  ;;  %s455_s29 = sand.u32 1, %s715_s12  }
  0x98   : > { %s456_s6 = scalar_lea.sflag [#allocation4], %s455_s29 }
  0x99   : > { %p563_p10 = pnand %p566_p7, %p832_p9 }
  0x9b   : > { %710 = dma.done.wait (!%p563_p10), %s456_s6, 32  }
  0x9c   : > { %712 = vsyncadd (!%p563_p10), %s456_s6, 4294967264  ;;  %s16_s19 = sadd.s32 1, %s743_s19   ;;  %s995_s12 = smov %s719_s13 }
  0x9d   : > { %p13_p11 = scmp.ge.s32.totalorder %s16_s19, 10   ;;  %s996_s13 = smov %s723_s14 }
  0x9e   : > { %s997_s14 = smov %s840_s4  ;;  %s998_s15 = smov %s735_s17 }
  0x9f   : > { %s999_s16 = smov %s739_s18  ;;  %s1000_s17 = smov %s1003_s22 }
  0xa0   : > { %s1001_s18 = smov %s1007_s23  ;;  %15 = sbr.rel (!%p13_p11) target bundleno = 5 (0x5), region = 98 }
  0xa7   :  { %461 = vsyncpa [#allocation4], 1 }
  0xa8   :  { %463 = vsyncpa [#allocation4 + $0x1], 1 }

</bundles_post_ra>
